<compile_context>
chip_gen: v6e
topology: v6e:2x2x1
jax: 0.10.0
libtpu: 0.0.40
codegen_flags: <defaults>
</compile_context>

<pallas_src>
import jax
import jax.numpy as jnp
from jax.experimental import pallas as pl
from jax.experimental.pallas import tpu as pltpu

LANES = 128
SUBLANES = 8
_CHUNK = SUBLANES * LANES        # 1024 elements = one (8, 128) f32 vreg
MAX_TILE_ROWS = 2048             # 1 MiB / streamed input block (f32)


def _flatten_to_slab(x):
    """Flatten to 1-D, zero-pad (only if needed) to a multiple of 8*128, view as (rows, 128).

    For typical autoencoder shapes (powers of two) the pad width is zero and this is a
    free reshape (no extra HBM copy). Zero padding contributes nothing to the sums.
    """
    flat = x.reshape(-1)
    n = flat.shape[0]
    padded = ((n + _CHUNK - 1) // _CHUNK) * _CHUNK
    if padded != n:
        flat = jnp.pad(flat, (0, padded - n))
    return flat.reshape(padded // LANES, LANES), n


def _make_sparse_loss_kernel(tile_rows, total_rows, n_mse, n_ct, n_ctca, alpha,
                             needs_mask):
    # All normalization constants are static -> baked into the kernel body.
    inv_mse = 1.0 / float(n_mse)
    inv_ct = 1.0 / float(n_ct)
    inv_ctca = 1.0 / float(n_ctca)
    alpha = float(alpha)

    def kernel(out_ref, tgt_ref, ct_ref, ctca_ref, loss_ref, acc_ref):
        i = pl.program_id(0)

        @pl.when(i == 0)
        def _init():
            acc_ref[...] = jnp.zeros_like(acc_ref)

        diff = out_ref[...].astype(jnp.float32) - tgt_ref[...].astype(jnp.float32)
        sq = diff * diff

        if needs_mask:
            # Partial last tile: rows past the (lane-padded) array are unspecified.
            row_ids = i * tile_rows + jax.lax.broadcasted_iota(
                jnp.int32, (tile_rows, LANES), 0)
            sq = jnp.where(row_ids < total_rows, sq, 0.0)

        # Per-tile partial sums stay on the VPU (plain vreg adds over the leading
        # axis); the expensive cross-lane/cross-sublane XLU reduction happens
        # exactly once, in the finalize step below.
        acc_ref[...] += jnp.sum(
            sq.reshape(tile_rows // SUBLANES, SUBLANES, LANES), axis=0)

        @pl.when(i == pl.num_programs(0) - 1)
        def _finalize():
            sq_sum = jnp.sum(acc_ref[...])
            # Tiny resident encodings: reduced once here, not every grid step.
            l1_ct = jnp.sum(jnp.abs(ct_ref[...].astype(jnp.float32)))
            l1_ctca = jnp.sum(jnp.abs(ctca_ref[...].astype(jnp.float32)))
            mse = sq_sum * inv_mse
            l1_penalty = alpha * (l1_ct * inv_ct + l1_ctca * inv_ctca)
            loss_ref[0, 0] = mse + l1_penalty

    return kernel


def sparse_loss(outputs, targets, ct_enc, ctca_enc, factor=1.0, alpha=0.001):
    # `factor` kept for signature parity with the PyTorch module; unused in forward.
    del factor

    out2d, n_mse = _flatten_to_slab(outputs)
    tgt2d, n_tgt = _flatten_to_slab(targets)
    assert n_mse == n_tgt, "outputs/targets must have the same number of elements"
    ct2d, n_ct = _flatten_to_slab(ct_enc)
    ctca2d, n_ctca = _flatten_to_slab(ctca_enc)

    rows = out2d.shape[0]                       # multiple of 8 by construction
    tile_rows = rows if rows <= MAX_TILE_ROWS else MAX_TILE_ROWS
    grid = pl.cdiv(rows, tile_rows)
    needs_mask = (rows % tile_rows) != 0        # only the partial last tile needs it

    kernel = _make_sparse_loss_kernel(
        tile_rows, rows, n_mse, n_ct, n_ctca, alpha, needs_mask)

    loss = pl.pallas_call(
        kernel,
        out_shape=jax.ShapeDtypeStruct((1, 1), jnp.float32),
        grid=(grid,),
        in_specs=[
            pl.BlockSpec((tile_rows, LANES), lambda i: (i, 0)),   # outputs (streamed)
            pl.BlockSpec((tile_rows, LANES), lambda i: (i, 0)),   # targets (streamed)
            pl.BlockSpec(ct2d.shape, lambda i: (0, 0)),           # ct_enc  (resident)
            pl.BlockSpec(ctca2d.shape, lambda i: (0, 0)),         # ctca_enc (resident)
        ],
        out_specs=pl.BlockSpec((1, 1), lambda i: (0, 0), memory_space=pltpu.SMEM),
        scratch_shapes=[pltpu.VMEM((SUBLANES, LANES), jnp.float32)],
        compiler_params=pltpu.CompilerParams(
            dimension_semantics=("arbitrary",)),
    )(out2d, tgt2d, ct2d, ctca2d)

    return loss[0, 0]


def _reference(outputs, targets, ct_enc, ctca_enc, alpha=0.001):
    return jnp.mean((outputs.astype(jnp.float32) - targets.astype(jnp.float32)) ** 2) + alpha * (
        jnp.mean(jnp.abs(ct_enc.astype(jnp.float32)))
        + jnp.mean(jnp.abs(ctca_enc.astype(jnp.float32)))
    )


if __name__ == "__main__":
    key = jax.random.PRNGKey(0)
    k1, k2, k3, k4, k5, k6 = jax.random.split(key, 6)

    # Small shapes consistent with an autoencoder forward:
    #   outputs/targets: reconstructed images (NCHW), encodings: bottleneck features.
    outputs = jax.random.normal(k1, (2, 4, 16, 16), dtype=jnp.float32)
    targets = jax.random.normal(k2, (2, 4, 16, 16), dtype=jnp.float32)
    ct_enc = jax.random.normal(k3, (2, 32), dtype=jnp.float32)
    ctca_enc = jax.random.normal(k4, (2, 32), dtype=jnp.float32)

    loss = sparse_loss(outputs, targets, ct_enc, ctca_enc, factor=1.0, alpha=0.001)
    loss = jax.block_until_ready(loss)
    ref = _reference(outputs, targets, ct_enc, ctca_enc, alpha=0.001)
    assert jnp.allclose(loss, ref, rtol=1e-5, atol=1e-6), (loss, ref)

    # Second check exercises the multi-tile grid + partial-tile masking + lane-pad path.
    big_out = jax.random.normal(k5, (3, 7, 129, 129), dtype=jnp.float32)
    big_tgt = jax.random.normal(k6, (3, 7, 129, 129), dtype=jnp.float32)
    loss2 = sparse_loss(big_out, big_tgt, ct_enc, ctca_enc, factor=1.0, alpha=0.001)
    loss2 = jax.block_until_ready(loss2)
    ref2 = _reference(big_out, big_tgt, ct_enc, ctca_enc, alpha=0.001)
    assert jnp.allclose(loss2, ref2, rtol=1e-5, atol=1e-6), (loss2, ref2)

    print("KERNEL_OK")
</pallas_src>

<mosaic_0001>
module attributes {stable_mosaic.version = 11 : i64} {
  func.func @kernel(%arg0: i32, %arg1: memref<16x128xf32, #tpu.memory_space<vmem>>, %arg2: memref<16x128xf32, #tpu.memory_space<vmem>>, %arg3: memref<8x128xf32, #tpu.memory_space<vmem>>, %arg4: memref<8x128xf32, #tpu.memory_space<vmem>>, %arg5: memref<1x1xf32, #tpu.memory_space<smem>>, %arg6: memref<8x128xf32, #tpu.memory_space<vmem>>) attributes {dimension_semantics = [#tpu.dimension_semantics<arbitrary>], iteration_bounds = array<i64: 1>, scalar_prefetch = 0 : i64, scratch_operands = 1 : i64, tpu.core_type = #tpu.core_type<tc>, window_params = [{transform_indices = @transform_0, window_bounds = array<i64: 16, 128>}, {transform_indices = @transform_1, window_bounds = array<i64: 16, 128>}, {pipeline_mode = #tpu.pipeline_mode<synchronous>, transform_indices = @transform_2, window_bounds = array<i64: 8, 128>}, {pipeline_mode = #tpu.pipeline_mode<synchronous>, transform_indices = @transform_3, window_bounds = array<i64: 8, 128>}, {transform_indices = @transform_4, window_bounds = array<i64: 1, 1>}]} {
    %c0_i32 = arith.constant 0 : i32
    %0 = arith.cmpi eq, %arg0, %c0_i32 : i32
    %1 = arith.extui %0 : i1 to i32
    %c0_i32_0 = arith.constant 0 : i32
    %2 = arith.cmpi ne, %1, %c0_i32_0 : i32
    scf.if %2 {
      %cst_10 = arith.constant 0.000000e+00 : f32
      %15 = vector.broadcast %cst_10 : f32 to vector<8x128xf32>
      %c0_11 = arith.constant 0 : index
      %c0_12 = arith.constant 0 : index
      %16 = vector.load %arg6[%c0_11, %c0_12] : memref<8x128xf32, #tpu.memory_space<vmem>>, vector<8x128xf32>
      tpu.vector_store %arg6[%c0_11, %c0_12], %15 {strides = array<i32>} : memref<8x128xf32, #tpu.memory_space<vmem>>, vector<8x128xf32>,
    } else {
    }
    %c0 = arith.constant 0 : index
    %c0_1 = arith.constant 0 : index
    %3 = vector.load %arg1[%c0, %c0_1] : memref<16x128xf32, #tpu.memory_space<vmem>>, vector<16x128xf32>
    %c0_2 = arith.constant 0 : index
    %c0_3 = arith.constant 0 : index
    %4 = vector.load %arg2[%c0_2, %c0_3] : memref<16x128xf32, #tpu.memory_space<vmem>>, vector<16x128xf32>
    %5 = arith.subf %3, %4 : vector<16x128xf32>
    %6 = arith.mulf %5, %5 : vector<16x128xf32>
    %c0_4 = arith.constant 0 : index
    %c0_5 = arith.constant 0 : index
    %7 = vector.load %arg6[%c0_4, %c0_5] : memref<8x128xf32, #tpu.memory_space<vmem>>, vector<8x128xf32>
    %8 = vector.shape_cast %6 : vector<16x128xf32> to vector<2x8x128xf32>
    %cst = arith.constant dense<0.000000e+00> : vector<8x128xf32>
    %9 = vector.multi_reduction <add>, %8, %cst [0] : vector<2x8x128xf32> to vector<8x128xf32>
    %10 = arith.addf %7, %9 : vector<8x128xf32>
    %c0_6 = arith.constant 0 : index
    %c0_7 = arith.constant 0 : index
    %11 = vector.load %arg6[%c0_6, %c0_7] : memref<8x128xf32, #tpu.memory_space<vmem>>, vector<8x128xf32>
    tpu.vector_store %arg6[%c0_6, %c0_7], %10 {strides = array<i32>} : memref<8x128xf32, #tpu.memory_space<vmem>>, vector<8x128xf32>,
    %c0_i32_8 = arith.constant 0 : i32
    %12 = arith.cmpi eq, %arg0, %c0_i32_8 : i32
    %13 = arith.extui %12 : i1 to i32
    %c0_i32_9 = arith.constant 0 : i32
    %14 = arith.cmpi ne, %13, %c0_i32_9 : i32
    scf.if %14 {
      %c0_10 = arith.constant 0 : index
      %c0_11 = arith.constant 0 : index
      %15 = vector.load %arg6[%c0_10, %c0_11] : memref<8x128xf32, #tpu.memory_space<vmem>>, vector<8x128xf32>
      %16 = vector.shape_cast %15 : vector<8x128xf32> to vector<1x8x128xf32>
      %cst_12 = arith.constant dense<0.000000e+00> : vector<1xf32>
      %17 = vector.multi_reduction <add>, %16, %cst_12 [1, 2] : vector<1x8x128xf32> to vector<1xf32>
      %18 = vector.shape_cast %17 : vector<1xf32> to vector<1x1x1xf32>
      %19 = vector.extract %18[0, 0, 0] : f32 from vector<1x1x1xf32>
      %c0_13 = arith.constant 0 : index
      %c0_14 = arith.constant 0 : index
      %20 = vector.load %arg3[%c0_13, %c0_14] : memref<8x128xf32, #tpu.memory_space<vmem>>, vector<8x128xf32>
      %21 = math.absf %20 : vector<8x128xf32>
      %22 = vector.shape_cast %21 : vector<8x128xf32> to vector<1x8x128xf32>
      %cst_15 = arith.constant dense<0.000000e+00> : vector<1xf32>
      %23 = vector.multi_reduction <add>, %22, %cst_15 [1, 2] : vector<1x8x128xf32> to vector<1xf32>
      %24 = vector.shape_cast %23 : vector<1xf32> to vector<1x1x1xf32>
      %25 = vector.extract %24[0, 0, 0] : f32 from vector<1x1x1xf32>
      %c0_16 = arith.constant 0 : index
      %c0_17 = arith.constant 0 : index
      %26 = vector.load %arg4[%c0_16, %c0_17] : memref<8x128xf32, #tpu.memory_space<vmem>>, vector<8x128xf32>
      %27 = math.absf %26 : vector<8x128xf32>
      %28 = vector.shape_cast %27 : vector<8x128xf32> to vector<1x8x128xf32>
      %cst_18 = arith.constant dense<0.000000e+00> : vector<1xf32>
      %29 = vector.multi_reduction <add>, %28, %cst_18 [1, 2] : vector<1x8x128xf32> to vector<1xf32>
      %30 = vector.shape_cast %29 : vector<1xf32> to vector<1x1x1xf32>
      %31 = vector.extract %30[0, 0, 0] : f32 from vector<1x1x1xf32>
      %cst_19 = arith.constant 4.8828125E-4 : f32
      %32 = arith.mulf %19, %cst_19 : f32
      %cst_20 = arith.constant 1.562500e-02 : f32
      %33 = arith.mulf %25, %cst_20 : f32
      %cst_21 = arith.constant 1.562500e-02 : f32
      %34 = arith.mulf %31, %cst_21 : f32
      %35 = arith.addf %33, %34 : f32
      %cst_22 = arith.constant 1.000000e-03 : f32
      %36 = arith.mulf %cst_22, %35 : f32
      %37 = arith.addf %32, %36 : f32
      %c0_23 = arith.constant 0 : index
      %c0_24 = arith.constant 0 : index
      %38 = memref.load %arg5[%c0_23, %c0_24] : memref<1x1xf32, #tpu.memory_space<smem>>
      memref.store %37, %arg5[%c0_23, %c0_24] : memref<1x1xf32, #tpu.memory_space<smem>>
    } else {
    }
    return
  }
  func.func @transform_0(%arg0: i32) -> (i32, i32) {
    %c0_i32 = arith.constant 0 : i32
    %c0_i32_0 = arith.constant 0 : i32
    return %arg0, %c0_i32 : i32, i32
  }
  func.func @transform_1(%arg0: i32) -> (i32, i32) {
    %c0_i32 = arith.constant 0 : i32
    %c0_i32_0 = arith.constant 0 : i32
    return %arg0, %c0_i32 : i32, i32
  }
  func.func @transform_2(%arg0: i32) -> (i32, i32) {
    %c0_i32 = arith.constant 0 : i32
    %c0_i32_0 = arith.constant 0 : i32
    %c0_i32_1 = arith.constant 0 : i32
    return %c0_i32, %c0_i32_0 : i32, i32
  }
  func.func @transform_3(%arg0: i32) -> (i32, i32) {
    %c0_i32 = arith.constant 0 : i32
    %c0_i32_0 = arith.constant 0 : i32
    %c0_i32_1 = arith.constant 0 : i32
    return %c0_i32, %c0_i32_0 : i32, i32
  }
  func.func @transform_4(%arg0: i32) -> (i32, i32) {
    %c0_i32 = arith.constant 0 : i32
    %c0_i32_0 = arith.constant 0 : i32
    %c0_i32_1 = arith.constant 0 : i32
    return %c0_i32, %c0_i32_0 : i32, i32
  }
}

</mosaic_0001>

<bundles_post_ra>
// kernel: tpu_custom_call.1
= control target key start
LH: loop header
LB: loop body
LE: loop exit
PB: predicated region body
PF: predicated region fallthrough
CT: control target
= control target key end

     0   :  { %9 = vsyncpa [#allocation4], 0  ;;  %s301_s0 = inlined_call_operand.hbm [shape: f32[16,128], index: 0, kind: input, shape index: {}]   ;;  %s302_s1 = inlined_call_operand.hbm [shape: f32[16,128], index: 1, kind: input, shape index: {}]   ;;  %s303_s2 = inlined_call_operand.hbm [shape: f32[8,128], index: 2, kind: input, shape index: {}]   ;;  %s304_s3 = inlined_call_operand.hbm [shape: f32[8,128], index: 3, kind: input, shape index: {}]   ;;  %s305_s4 = inlined_call_operand.hbm [shape: f32[1,1], index: 4, kind: output, shape index: {}]  }
   0x1   :  { %10 = vsyncpa [#allocation7], 0 }
   0x2   :  { %11 = vsyncpa [#allocation10], 0 }
   0x3   :  { %12 = vsyncpa [#allocation5], 0  ;;  %s254_s15 = smov [#allocation6]   ;;  %s255_s17 = smov [#allocation3]  }
   0x4   :  { %s30_s16 = sshll.u32 %s254_s15, 4  ;;  %s18_s18 = sshll.u32 %s255_s17, 4  ;;  %s31_s16 = int_to_ptr.vmem [resolvable:$true] %s30_s16  ;;  %s19_s18 = int_to_ptr.vmem [resolvable:$true] %s18_s18 }
   0x5   :  { %s166_s19 = scalar_lea.vmem %s31_s16, 256  ;;  %p171_p1 = scmp.lt.s32.totalorder %s31_s16, %s31_s16 }
   0x6   :  { %p167_p0 = scmp.ne.s32.totalorder %s31_s16, %s166_s19  ;;  %p172_p2 = scmp.lt.s32.totalorder %s166_s19, %s166_s19 }
   0x8   :  { %p173_p3 = por %p172_p2, %p171_p1 }
   0xa   :  { %p174_p4 = pnand %p173_p3, %p167_p0 }
   0xc   :  { %177 = shalt.err (!%p174_p4)
}
   0xd   :  { %s256_s20 = smov 128   ;;  %s257_s21 = smov 8  }
   0xe   :  { %36 = dma.hbm_to_vmem [thread:$0]  %s302_s1, 256, %s31_s16, [#allocation7], %s256_s20, %s256_s20, %s257_s21  }
   0xf   :  { %s186_s24 = scalar_lea.vmem %s19_s18, 256  ;;  %p191_p6 = scmp.lt.s32.totalorder %s19_s18, %s19_s18 }
  0x10   :  { %p187_p5 = scmp.ne.s32.totalorder %s19_s18, %s186_s24  ;;  %p192_p7 = scmp.lt.s32.totalorder %s186_s24, %s186_s24 }
  0x12   :  { %p193_p8 = por %p192_p7, %p191_p6 }
  0x14   :  { %p194_p9 = pnand %p193_p8, %p187_p5 }
  0x16   :  { %197 = shalt.err (!%p194_p9)
}
  0x17   :  { %24 = dma.hbm_to_vmem [thread:$0]  %s301_s0, 256, %s19_s18, [#allocation4], %s256_s20, %s256_s20, %s257_s21  }
  0x18   :  { %s258_s27 = smov [#allocation8]   ;;  %s259_s29 = smov [#allocation9]  }
  0x19   :  { %s43_s28 = sshll.u32 %s258_s27, 4  ;;  %s53_s30 = sshll.u32 %s259_s29, 4  ;;  %s44_s28 = int_to_ptr.vmem [resolvable:$true] %s43_s28  ;;  %s54_s30 = int_to_ptr.vmem [resolvable:$true] %s53_s30 }
  0x1a   :  { %s206_s5 = scalar_lea.vmem %s44_s28, 128  ;;  %p211_p11 = scmp.lt.s32.totalorder %s44_s28, %s44_s28 }
  0x1b   :  { %p207_p10 = scmp.ne.s32.totalorder %s44_s28, %s206_s5  ;;  %p212_p12 = scmp.lt.s32.totalorder %s206_s5, %s206_s5 }
  0x1d   :  { %p213_p13 = por %p212_p12, %p211_p11 }
  0x1f   :  { %p214_p0 = pnand %p213_p13, %p207_p10 }
  0x21   :  { %217 = shalt.err (!%p214_p0)
}
  0x22   :  { %46 = dma.hbm_to_vmem [thread:$0]  %s303_s2, 128, %s44_s28, [#allocation7]  }
  0x23   :  { %s226_s7 = scalar_lea.vmem %s54_s30, 128  ;;  %p231_p2 = scmp.lt.s32.totalorder %s54_s30, %s54_s30 }
  0x24   :  { %p227_p1 = scmp.ne.s32.totalorder %s54_s30, %s226_s7  ;;  %p232_p3 = scmp.lt.s32.totalorder %s226_s7, %s226_s7 }
  0x26   :  { %p233_p4 = por %p232_p3, %p231_p2 }
  0x28   :  { %p234_p5 = pnand %p233_p4, %p227_p1 }
  0x2a   :  { %237 = shalt.err (!%p234_p5)
}
  0x2b   :  { %56 = dma.hbm_to_vmem [thread:$0]  %s304_s3, 128, %s54_s30, [#allocation10]  }
  0x2c   :  { %246 = dma.done.wait [#allocation4], 256  }
  0x2d   :  { %247 = vsyncadd [#allocation4], 4294967040 }
  0x2e   :  { %248 = dma.done.wait [#allocation7], 384  }
  0x2f   :  { %249 = vsyncadd [#allocation7], 4294966912 }
  0x30   :  { %250 = dma.done.wait [#allocation10], 128  }
  0x31   :  { %251 = vsyncadd [#allocation10], 4294967168  ;;  %v110_v0 = vld [vmem:[#allocation9] sm:$0xff]  ;;  %v74_v1 = vld [vmem:[#allocation3] sm:$0xff]  ;;  %s260_s16 = smov [#allocation11]  }
  0x32   :  { %v75_v2 = vld [vmem:[#allocation3 + $0x8] sm:$0xff]  ;;  %v111_v3 = vand.u32 2147483647, %v110_v0  ;;  %v76_v4 = vld [vmem:[#allocation6] sm:$0xff]  ;;  %v77_v5 = vld [vmem:[#allocation6 + $0x8] sm:$0xff] }
  0x33   :  { %v78_v6 = vsub.f32 %v74_v1, %v76_v4  ;;  %v79_v7 = vsub.f32 %v75_v2, %v77_v5  ;;  %v99_v10 = vld [vmem:[#allocation8] sm:$0xff] }
  0x34   :  { %112 = vadd.xlane.f32.xlu1 %v111_v3  ;;  %v100_v12 = vand.u32 2147483647, %v99_v10 }
  0x35   :  { %v80_v8 = vmul.f32 %v78_v6, %v78_v6  ;;  %v81_v9 = vmul.f32 %v79_v7, %v79_v7 }
  0x37   :  { %v83_v11 = vadd.f32 %v81_v9, %v80_v8 }
  0x39   :  { %90 = vadd.xlane.f32.xlu0 %v83_v11 }
  0x3d   :  { %101 = vadd.xlane.f32.xlu0 %v100_v12 }
  0xbd   :  { %v113_v13 = vpop.xlane.xlu1 %112 }
  0xbe   :  { %v114_v14 = vrot.slane %v113_v13, 4 }
  0xc0   :  { %v115_v15 = vadd.f32 %v114_v14, %v113_v13 }
  0xc2   :  { %v91_v16 = vpop.xlane.xlu0 %90  ;;  %v116_v19 = vrot.slane %v115_v15, 2 }
  0xc3   :  { %v92_v17 = vrot.slane %v91_v16, 4 }
  0xc4   :  { %v117_v25 = vadd.f32 %v116_v19, %v115_v15 }
  0xc5   :  { %v93_v18 = vadd.f32 %v92_v17, %v91_v16 }
  0xc6   :  { %v102_v20 = vpop.xlane.xlu0 %101  ;;  %v118_v30 = vrot.slane %v117_v25, 1 }
  0xc7   :  { %v94_v21 = vrot.slane %v93_v18, 2  ;;  %v103_v22 = vrot.slane %v102_v20, 4 }
  0xc8   :  { %v119_v33 = vadd.f32 %v118_v30, %v117_v25 }
  0xc9   :  { %v104_v23 = vadd.f32 %v103_v22, %v102_v20  ;;  %v95_v24 = vadd.f32 %v94_v21, %v93_v18 }
  0xcb   :  { %v105_v26 = vrot.slane %v104_v23, 2  ;;  %v96_v27 = vrot.slane %v95_v24, 1 }
  0xcd   :  { %v106_v28 = vadd.f32 %v105_v26, %v104_v23  ;;  %v97_v29 = vadd.f32 %v96_v27, %v95_v24 }
  0xcf   :  { %145 = vpush %v97_v29  ;;  %v107_v31 = vrot.slane %v106_v28, 1 }
  0xd1   :  { %v108_v32 = vadd.f32 %v107_v31, %v106_v28 }
  0xd3   :  { %147 = vpush %v108_v32 }
  0xd4   :  { %149 = vpush %v119_v33 }
 0x100   :  { %s146_s2 = spop %145 }
 0x101   :  { %s121_s13 = smul.f32 0.00048828125, %s146_s2 }
 0x104   :  { %s148_s3 = spop %147 }
 0x105   :  { %s122_s9 = smul.f32 0.015625, %s148_s3  ;;  %s150_s10 = spop %149 }
 0x106   :  { %s123_s11 = smul.f32 0.015625, %s150_s10 }
 0x108   :  { %s124_s12 = sadd.f32 %s123_s11, %s122_s9 }
 0x10a   :  { %s125_s14 = smul.f32 0.001, %s124_s12 }
 0x10c   :  { %s126_s15 = sadd.f32 %s125_s14, %s121_s13 }
 0x10e   :  { %128 = sst [smem:[#allocation11]] %s126_s15 }
 0x10f   :  { %136 = dma.smem_to_hbm %s260_s16, 16, %s305_s4, [#allocation5]  }
 0x110   :  { %252 = dma.done.wait [#allocation5], 16  }
 0x111   :  { %253 = vsyncadd [#allocation5], 4294967280 }
 0x112   :  { %140 = sfence }
 0x113   :  { %141 = vsyncpa [#allocation4], 1 }
 0x114   :  { %142 = vsyncpa [#allocation7], 1 }
 0x115   :  { %143 = vsyncpa [#allocation10], 1 }
 0x116   :  { %144 = vsyncpa [#allocation5], 1 }

</bundles_post_ra>
